<compile_context>
chip_gen: v7x
topology: tpu7x:2x2x1
jax: 0.10.0
libtpu: 0.0.40
codegen_flags: <defaults>
</compile_context>

<pallas_src>
import functools

import numpy as np
import jax
import jax.numpy as jnp
from jax import lax
from jax.scipy.stats import norm
from jax.scipy.special import ndtri
from jax.experimental import pallas as pl
from jax.experimental.pallas import tpu as pltpu

MIN_LOG = -20.0
MAX_LOG = 0.0
_INV_SQRT_2PI = 1.0 / np.sqrt(2.0 * np.pi)
_KL_CONST = float(np.log(MAX_LOG - MIN_LOG) - np.log(2.0 * np.pi * np.e) / 2.0)


# ----------------------------------------------------------------------------
# Pallas kernel: scale a 2-D slab by a per-row column (R,1) or per-lane row (1,C).
# ----------------------------------------------------------------------------
def _scale_kernel(m_ref, x_ref, o_ref):
    # Multiplier stays f32; product computed in f32 and down-cast once.
    x = x_ref[...].astype(jnp.float32)
    m = m_ref[...].astype(jnp.float32)
    o_ref[...] = (x * m).astype(o_ref.dtype)


def _best_lane_tile(hw, cap):
    """Largest multiple of 128 <= cap that minimizes padded-lane waste for hw."""
    cap = max(128, min(cap, ((hw + 127) // 128) * 128))
    best_t, best_waste = 128, None
    for k in range(1, cap // 128 + 1):
        t = k * 128
        waste = pl.cdiv(hw, t) * t - hw
        if best_waste is None or waste < best_waste or (waste == best_waste and t > best_t):
            best_t, best_waste = t, waste
    return best_t


def _pick_tiles(rows, hw, itemsize, budget_bytes=24 * 1024 * 1024):
    """Pick (tile_r, tile_hw):
       * double-buffered in+out footprint (4 * tile bytes) <= budget_bytes
         (24 MiB -> fits v7x's 64 MiB VMEM with headroom; v5e/v6e trivially),
       * sublane tiles rounded to the dtype pack (8 / 16 / 32),
       * lane tiles are full-extent or divisor-aware multiples of 128,
       * at least 2 grid blocks whenever the array allows it (megacore + pipelining).
    """
    pack = max(8, 32 // itemsize)                  # f32:8, bf16:16, int8/fp8:32
    elems = budget_bytes // (4 * itemsize)         # per-tile element budget

    if rows * hw <= elems:
        tile_r, tile_hw = rows, hw                 # full extent
    elif hw * pack <= elems:
        tile_hw = hw                               # keep full lane extent, tile rows
        tile_r = max(pack, ((elems // hw) // pack) * pack)
    else:
        tile_r = rows if rows < pack else pack     # must tile lanes too
        cap = max(128, ((elems // max(tile_r, 1)) // 128) * 128)
        tile_hw = _best_lane_tile(hw, cap)

    # Guarantee >= 2 grid blocks so both v7x TensorCores get work and the
    # in/out DMA pipeline actually overlaps.
    if pl.cdiv(rows, tile_r) * pl.cdiv(hw, tile_hw) == 1:
        if rows >= 2 * pack:
            tile_r = max(pack, ((rows // 2) // pack) * pack)
        elif hw >= 256:
            tile_hw = _best_lane_tile(hw, max(128, ((hw // 2) // 128) * 128))

    return int(tile_r), int(tile_hw)


def _pallas_scale_2d(x2d, m2d, *, in_place):
    """out = x2d * m2d, tiled Pallas kernel.  m2d is (rows, 1) or (1, cols), f32."""
    rows, cols = x2d.shape
    dtype = x2d.dtype
    itemsize = np.dtype(dtype).itemsize
    tile_r, tile_c = _pick_tiles(rows, cols, itemsize)
    grid = (pl.cdiv(rows, tile_r), pl.cdiv(cols, tile_c))

    if m2d.shape[1] == 1:                          # per-row (per-channel) column
        m_spec = pl.BlockSpec((tile_r, 1), lambda i, j: (i, 0))
    else:                                          # lane-dense multiplier row
        m_spec = pl.BlockSpec((1, tile_c), lambda i, j: (0, j))

    kwargs = {}
    if in_place:
        # The conv output is dead after scaling -> scale it in place.
        kwargs["input_output_aliases"] = {1: 0}

    return pl.pallas_call(
        _scale_kernel,
        out_shape=jax.ShapeDtypeStruct((rows, cols), dtype),
        grid=grid,
        in_specs=[
            m_spec,
            pl.BlockSpec((tile_r, tile_c), lambda i, j: (i, j)),
        ],
        out_specs=pl.BlockSpec((tile_r, tile_c), lambda i, j: (i, j)),
        cost_estimate=pl.CostEstimate(
            flops=rows * cols,
            transcendentals=0,
            bytes_accessed=2 * rows * cols * itemsize,
        ),
        compiler_params=pltpu.CompilerParams(
            dimension_semantics=("parallel", "parallel"),
            vmem_limit_bytes=48 * 1024 * 1024,
        ),
        **kwargs,
    )(m2d, x2d)


def _scale_weights(weight, mult):
    """w_out[o, i, kh, kw] = weight[o, i, kh, kw] * mult[o]  (Pallas, O(C*Cin*k*k))."""
    C_out, C_in, kh, kw = weight.shape
    w2d = weight.reshape(C_out, C_in * kh * kw)
    m_col = mult.astype(jnp.float32).reshape(C_out, 1)
    out = _pallas_scale_2d(w2d, m_col, in_place=False)   # weights are live params
    return out.reshape(C_out, C_in, kh, kw)


def _per_channel_scale(x_nchw, mult_c):
    """out[n, c, h, w] = x[n, c, h, w] * mult_c[c]  (alternate activation-scale path)."""
    N, C, H, W = x_nchw.shape
    HW = H * W
    m_f32 = mult_c.astype(jnp.float32)

    if HW % 128 != 0 and (C * HW) % 128 == 0:
        # Lane-dense layout: present (N, C*H*W) so stores are unmasked full-lane vst.
        x2d = x_nchw.reshape(N, C * HW)
        m2d = jnp.repeat(m_f32, HW).reshape(1, C * HW)
    else:
        x2d = x_nchw.reshape(N * C, HW)
        m2d = jnp.broadcast_to(m_f32[None, :], (N, C)).reshape(N * C, 1)

    out = _pallas_scale_2d(x2d, m2d, in_place=True)
    return out.reshape(N, C, H, W)


# ----------------------------------------------------------------------------
# Plain-JAX glue: O(C) truncated-normal statistics (erfcx / CDF / inv-CDF / KL)
# ----------------------------------------------------------------------------
_ERFCX_COEFFS = (
    3e-21, 9.7e-20, 2.7e-20, -2.187e-18, -2.237e-18, 5.0681e-17, 7.4182e-17,
    -1.250795e-15, -1.864563e-15, 3.3478119e-14, 3.2525481e-14, -9.65469675e-13,
    1.94558685e-13, 2.8687950109e-11, -6.3180883409e-11, -7.75440020883e-10,
    4.521959811218e-09, 1.0764999465671e-08, -2.18864010492344e-07,
    7.74038306619849e-07, 4.13902798607301e-06, -6.916973302501207e-05,
    0.0004907758365258086, -0.002413163540417608, 0.009074997670705265,
    -0.026658668435305753, 0.05920993999819189, -0.08424913336651792,
    -0.004590054580646478,
)


def erfcx_jax(x):
    K = 3.75
    ax = jnp.abs(x)
    y = (ax - K) / (ax + K)
    y2 = 2.0 * y
    d = jnp.full_like(x, -4e-21)
    dd = jnp.zeros_like(x)
    for c in _ERFCX_COEFFS:
        d, dd = y2 * d - dd + c, d
    d = y * d - dd + 1.1775789345674017
    result = d / (1.0 + 2.0 * ax)
    result = jnp.where(jnp.isnan(result) | jnp.isinf(result), 1.0, result)
    neg = 2.0 * jnp.exp(x * x) - result
    neg = jnp.where(jnp.isnan(neg) | jnp.isinf(neg), 1.0, neg)
    return jnp.where(x <= 0.0, neg, result)


def mean_truncated_log_normal_reduced(mu, sigma, a, b):
    alpha = (a - mu) / sigma
    beta = (b - mu) / sigma
    z = norm.cdf(beta) - norm.cdf(alpha)
    mean = erfcx_jax((sigma - beta) / np.sqrt(2.0)) * jnp.exp(b - beta * beta / 2.0)
    mean = mean - erfcx_jax((sigma - alpha) / np.sqrt(2.0)) * jnp.exp(a - alpha * alpha / 2.0)
    return mean / (2.0 * z)


def snr_truncated_log_normal(mu, sigma, a, b):
    alpha = (a - mu) / sigma
    beta = (b - mu) / sigma
    z = norm.cdf(beta) - norm.cdf(alpha)
    ratio = erfcx_jax((sigma - beta) / np.sqrt(2.0)) * jnp.exp(b - mu - beta ** 2 / 2.0)
    ratio = ratio - erfcx_jax((sigma - alpha) / np.sqrt(2.0)) * jnp.exp(a - mu - alpha ** 2 / 2.0)
    den = 2.0 * z * erfcx_jax((2.0 * sigma - beta) / np.sqrt(2.0)) * jnp.exp(2.0 * (b - mu) - beta ** 2 / 2.0)
    den = den - 2.0 * z * erfcx_jax((2.0 * sigma - alpha) / np.sqrt(2.0)) * jnp.exp(2.0 * (a - mu) - alpha ** 2 / 2.0)
    den = den - ratio ** 2
    return ratio / jnp.sqrt(1e-08 + den)


def _train_stats(mu, log_sigma, key):
    """Truncated-normal sample -> multiplicator, plus KL scalar (all O(C))."""
    log_sigma_c = jnp.clip(log_sigma, -20.0, 5.0)
    mu_c = jnp.clip(mu, -20.0, 5.0)
    sigma = jnp.exp(log_sigma_c)
    alpha = (MIN_LOG - mu_c) / sigma
    beta = (MAX_LOG - mu_c) / sigma
    phi_a = norm.cdf(alpha)
    phi_b = norm.cdf(beta)
    z = phi_b - phi_a

    u = jax.random.uniform(key, shape=mu.shape, dtype=jnp.float32)
    gamma = phi_a + u * z
    t = jnp.clip(ndtri(jnp.clip(gamma, 1e-05, 1.0 - 1e-05)) * sigma + mu_c,
                 MIN_LOG, MAX_LOG)
    mult = jnp.exp(t)

    pdf = lambda v: jnp.exp(-0.5 * v * v) * _INV_SQRT_2PI
    kl = -log_sigma_c - jnp.log(z) - (alpha * pdf(alpha) - beta * pdf(beta)) / (2.0 * z)
    kl = jnp.mean(kl) + _KL_CONST
    return mult, kl


def _eval_multiplier(mu, log_sigma):
    log_sigma_c = jnp.clip(log_sigma, -20.0, 5.0)
    mu_c = jnp.clip(mu, -20.0, 5.0)
    sigma = jnp.exp(log_sigma_c)
    mult = mean_truncated_log_normal_reduced(mu_c, sigma, MIN_LOG, MAX_LOG)
    snr = snr_truncated_log_normal(mu_c, sigma, MIN_LOG, MAX_LOG)
    mask = jnp.where(snr > 1.0, 1.0, 0.0)
    return mult * mask


def _conv(x, weight, stride, padding):
    return lax.conv_general_dilated(
        x, weight,
        window_strides=(stride, stride),
        padding=[(padding, padding), (padding, padding)],
        dimension_numbers=("NCHW", "OIHW", "NCHW"))


# ----------------------------------------------------------------------------
# Module-level wrappers (Conv2d_SBP.forward) — multiplier folded into weights.
# ----------------------------------------------------------------------------
@functools.partial(jax.jit, static_argnames=("stride", "padding"))
def conv2d_sbp_forward_train(x, weight, mu, log_sigma, key, stride=1, padding=0):
    mult, kl = _train_stats(mu, log_sigma, key)
    w_scaled = _scale_weights(weight, mult)        # Pallas kernel (tiny)
    out = _conv(x, w_scaled, stride, padding)      # == mult * conv(x, weight)
    return out, kl


@functools.partial(jax.jit, static_argnames=("stride", "padding"))
def conv2d_sbp_forward_eval(x, weight, mu, log_sigma, stride=1, padding=0):
    mult = _eval_multiplier(mu, log_sigma)
    w_scaled = _scale_weights(weight, mult)        # Pallas kernel (tiny)
    return _conv(x, w_scaled, stride, padding)


# ----------------------------------------------------------------------------
if __name__ == "__main__":
    key = jax.random.PRNGKey(0)
    k_x, k_w, k_u, k_a, k_m = jax.random.split(key, 5)

    N, C_in, H, W = 2, 3, 18, 18
    C_out, ksz = 4, 3
    x = jax.random.normal(k_x, (N, C_in, H, W), dtype=jnp.float32)
    stdv = 1.0 / np.sqrt(C_in)
    weight = jax.random.uniform(k_w, (C_out, C_in, ksz, ksz), dtype=jnp.float32,
                                minval=-stdv, maxval=stdv)
    log_sigma = jnp.full((C_out,), -5.0, dtype=jnp.float32)   # init_logsigma=-5
    mu = jnp.zeros((C_out,), dtype=jnp.float32)

    y_ref = _conv(x, weight, 1, 0)                            # (2, 4, 16, 16)

    # --- training path: (output, kl), multiplier folded into the conv weights ---
    out, kl = conv2d_sbp_forward_train(x, weight, mu, log_sigma, k_u)
    out = jax.block_until_ready(out)
    kl = jax.block_until_ready(kl)
    mult_ref, kl_ref = _train_stats(mu, log_sigma, k_u)
    ref_out = y_ref * mult_ref[None, :, None, None]
    assert np.allclose(np.asarray(out), np.asarray(ref_out), rtol=1e-4, atol=1e-5)
    assert np.allclose(float(kl), float(kl_ref), rtol=1e-4, atol=1e-5)

    # --- eval path ---
    out_eval = conv2d_sbp_forward_eval(x, weight, mu, log_sigma)
    out_eval = jax.block_until_ready(out_eval)
    mult_eval = _eval_multiplier(mu, log_sigma)
    ref_eval = y_ref * mult_eval[None, :, None, None]
    assert np.allclose(np.asarray(out_eval), np.asarray(ref_eval), rtol=1e-4, atol=1e-5)

    # --- alternate activation-scale kernel, standard layout (HW % 128 == 0) ---
    out_scale = jax.jit(_per_channel_scale)(y_ref, mult_eval)
    out_scale = jax.block_until_ready(out_scale)
    assert np.allclose(np.asarray(out_scale), np.asarray(ref_eval), rtol=1e-5, atol=1e-6)

    # --- lane-dense path (HW=196 not a multiple of 128, but C*HW = 6272 is) ---
    a = jax.random.normal(k_a, (2, 32, 14, 14), dtype=jnp.float32)
    m = jax.random.uniform(k_m, (32,), dtype=jnp.float32, minval=0.5, maxval=1.5)
    out_ld = jax.jit(_per_channel_scale)(a, m)
    out_ld = jax.block_until_ready(out_ld)
    ref_ld = a * m[None, :, None, None]
    assert np.allclose(np.asarray(out_ld), np.asarray(ref_ld), rtol=1e-5, atol=1e-6)

    # --- native bf16 path (rows = N*C = 16 -> aligned to the 16-sublane bf16 pack) ---
    a_bf = jax.random.normal(k_a, (2, 8, 16, 16), dtype=jnp.float32).astype(jnp.bfloat16)
    m8 = m[:8]
    out_bf = jax.jit(_per_channel_scale)(a_bf, m8)
    out_bf = jax.block_until_ready(out_bf)
    ref_bf = (a_bf.astype(jnp.float32) * m8[None, :, None, None]).astype(jnp.bfloat16)
    assert out_bf.dtype == jnp.bfloat16
    assert np.allclose(np.asarray(out_bf.astype(jnp.float32)),
                       np.asarray(ref_bf.astype(jnp.float32)),
                       rtol=1e-2, atol=1e-2)

    print("KERNEL_OK")
</pallas_src>

<mosaic_0001>
module attributes {stable_mosaic.version = 11 : i64} {
  func.func @_scale_kernel(%arg0: i32, %arg1: i32, %arg2: memref<4x1xf32, #tpu.memory_space<vmem>>, %arg3: memref<4x27xf32, #tpu.memory_space<vmem>>, %arg4: memref<4x27xf32, #tpu.memory_space<vmem>>) attributes {dimension_semantics = [#tpu.dimension_semantics<parallel>, #tpu.dimension_semantics<parallel>], iteration_bounds = array<i64: 1, 1>, scalar_prefetch = 0 : i64, scratch_operands = 0 : i64, tpu.core_type = #tpu.core_type<tc>, window_params = [{transform_indices = @transform_0, window_bounds = array<i64: 4, 1>}, {transform_indices = @transform_1, window_bounds = array<i64: 4, 27>}, {transform_indices = @transform_2, window_bounds = array<i64: 4, 27>}]} {
    %c0 = arith.constant 0 : index
    %c0_0 = arith.constant 0 : index
    %0 = vector.load %arg3[%c0, %c0_0] : memref<4x27xf32, #tpu.memory_space<vmem>>, vector<4x27xf32>
    %c0_1 = arith.constant 0 : index
    %c0_2 = arith.constant 0 : index
    %1 = vector.load %arg2[%c0_1, %c0_2] : memref<4x1xf32, #tpu.memory_space<vmem>>, vector<4x1xf32>
    %2 = vector.broadcast %1 : vector<4x1xf32> to vector<4x27xf32>
    %3 = arith.mulf %0, %2 : vector<4x27xf32>
    %c0_3 = arith.constant 0 : index
    %c0_4 = arith.constant 0 : index
    %4 = vector.load %arg4[%c0_3, %c0_4] : memref<4x27xf32, #tpu.memory_space<vmem>>, vector<4x27xf32>
    tpu.vector_store %arg4[%c0_3, %c0_4], %3 {strides = array<i32>} : memref<4x27xf32, #tpu.memory_space<vmem>>, vector<4x27xf32>,
    return
  }
  func.func @transform_0(%arg0: i32, %arg1: i32) -> (i32, i32) {
    %c0_i32 = arith.constant 0 : i32
    %c0_i32_0 = arith.constant 0 : i32
    return %arg0, %c0_i32 : i32, i32
  }
  func.func @transform_1(%arg0: i32, %arg1: i32) -> (i32, i32) {
    %c0_i32 = arith.constant 0 : i32
    return %arg0, %arg1 : i32, i32
  }
  func.func @transform_2(%arg0: i32, %arg1: i32) -> (i32, i32) {
    %c0_i32 = arith.constant 0 : i32
    return %arg0, %arg1 : i32, i32
  }
}

</mosaic_0001>

<bundles_post_ra>
// kernel: conv2d_sbp_forward_train.1
= control target key start
LH: loop header
LB: loop body
LE: loop exit
PB: predicated region body
PF: predicated region fallthrough
CT: control target
= control target key end

     0   :  { %v27_v0 = vmov 0   ;;  %vm19_vm0 = vcmask 216064   ;;  %s52_s0 = inlined_call_operand.vmem [shape: f32[4,1], index: 0, kind: input, shape index: {}]   ;;  %s53_s1 = inlined_call_operand.vmem [shape: f32[4,27], index: 1, kind: input, shape index: {}]   ;;  %s54_s2 = inlined_call_operand.vmem [shape: f32[4,27], index: 2, kind: output, shape index: {}]  }
   0x1   :  { %26 = vset.pattern.permute.xlu0 %v27_v0  ;;  %v12_v1 = vld [vmem:[%s52_s0] sm:$0xf] }
   0x2   :  { %15 = vperm.xlu0 %26, %v12_v1   ;;  %v11_v2 = vld [vmem:[%s53_s1] sm:$0xf] }
  0x81   :  { %v16_v3 = vpop.permute.xlu0 %15 }
  0x82   :  { %v18_v4 = vmul.f32 %v16_v3, %v11_v2 }
  0x84   :  { %20 = vst.msk [vmem:[%s54_s2] sm:$0xf] %vm19_vm0, %v18_v4 }

</bundles_post_ra>
